<compile_context>
chip_gen: v7x
topology: tpu7x:2x2x1
jax: 0.10.0
libtpu: 0.0.40
codegen_flags: <defaults>
</compile_context>

<pallas_src>
import functools
import math

import jax
import jax.numpy as jnp
from jax.experimental import pallas as pl
from jax.experimental.pallas import tpu as pltpu


_LANE = 128       # TPU lane width (last-dim tiling unit)
_TILE_B = 256     # target batch tile: fills 256-wide MXU M on v6e/v7x (2x128 on v5e)


# ------------------------------ activations ---------------------------------

_ACT_FNS = {
    "sigmoid": jax.nn.sigmoid,
    "relu": lambda y: jnp.maximum(y, 0.0),
    "tanh": jnp.tanh,
    "gelu": jax.nn.gelu,
    "elu": jax.nn.elu,
    "silu": jax.nn.silu,
    "softplus": jax.nn.softplus,
    "leaky_relu": jax.nn.leaky_relu,
    "softmax": jax.nn.softmax,
    "log_softmax": jax.nn.log_softmax,
}

# Activations that reduce across the feature (lane) axis: padded lanes must be
# masked out before applying them.
_CROSS_LANE_ACTS = ("softmax", "log_softmax")

_TRANSCENDENTAL_ACTS = ("sigmoid", "tanh", "gelu", "elu", "silu", "softplus",
                        "softmax", "log_softmax")


def _round_up(n, m):
    return -(-n // m) * m


def _get_act_fn(act):
    fn = _ACT_FNS.get(act)
    if fn is None:
        fn = getattr(jax.nn, act, None)
    if fn is None or not callable(fn):
        # TODO(synk): torch.nn.functional activations without a jax.nn
        # counterpart are not wired up here.
        raise NotImplementedError(f"activation '{act}' not implemented")
    return fn


def _apply_act(y, act, valid_width):
    """Apply activation to an f32 tile; `valid_width` = unpadded lane count."""
    if act is None:
        return y
    fn = _get_act_fn(act)
    padded_width = y.shape[-1]
    if act in _CROSS_LANE_ACTS and padded_width != valid_width:
        # Normalizing activations must not see the zero-padded lanes.
        lanes = jax.lax.broadcasted_iota(jnp.int32, y.shape, dimension=1)
        valid = lanes < valid_width
        y = jnp.where(valid, y, -1e30)
        y = fn(y)
        return jnp.where(valid, y, 0.0)
    return fn(y)


# ----------------------------- Pallas kernel ---------------------------------

def _mlp_fused_kernel(*refs, acts, valid_widths):
    """Fused MLP forward on one batch tile.

    refs = (x_ref, w0_ref, b0_ref, w1_ref, b1_ref, ..., o_ref)
    Weights are bf16 (in_pad, out_pad); biases are f32 (1, out_pad); every
    layer width is lane-padded to a multiple of 128 so all stores/intermediates
    are lane-dense.  Intermediates stay in vregs/VMEM.
    """
    x_ref, o_ref = refs[0], refs[-1]
    y = x_ref[...]
    for i, act in enumerate(acts):            # static Python loop over layers
        w_ref = refs[1 + 2 * i]
        b_ref = refs[2 + 2 * i]
        # bf16 x bf16 -> f32 accumulation on the MXU.
        y = jnp.dot(y.astype(w_ref.dtype), w_ref[...],
                    preferred_element_type=jnp.float32)
        y = y + b_ref[...]                    # bias kept in f32 (exact add)
        y = _apply_act(y, act, valid_widths[i])   # elementwise math stays f32
    o_ref[...] = y.astype(o_ref.dtype)


@functools.partial(jax.jit, static_argnames=("acts", "valid_widths", "out_dim"))
def _mlp_forward(x, params, acts, valid_widths, out_dim):
    """Batch-tiled fused pallas_call; slices off lane padding at the end."""
    B, d_in = x.shape
    dout_pad = params[-1].shape[-1]           # lane-padded width of last layer
    itemsize = x.dtype.itemsize
    param_bytes = sum(int(p.size) * p.dtype.itemsize for p in params)
    max_width = max(max(int(p.shape[-1]) for p in params), d_in)

    # --- batch tile: multiple of 8 sublanes, target 256 rows -----------------
    tile_b = min(_TILE_B, _round_up(B, 8))

    def _vmem_watermark(tb):
        return (2 * tb * d_in * itemsize          # double-buffered input tile
                + 2 * tb * dout_pad * itemsize    # double-buffered output tile
                + 2 * param_bytes                 # resident (double-buffered) params
                + 4 * tb * max_width * 4)         # f32 intermediates / slack

    # Keep the watermark well under v7x's 64 MiB per-core VMEM.
    while tile_b > 8 and _vmem_watermark(tile_b) > (40 << 20):
        tile_b = max(8, (tile_b // 2) // 8 * 8)
    vmem_limit = int(min(max(_vmem_watermark(tile_b) + (4 << 20), 16 << 20),
                         48 << 20))

    grid = (pl.cdiv(B, tile_b),)

    # --- cost estimate for XLA's scheduler -----------------------------------
    n_layers = len(acts)
    flops = 2 * B * sum(int(params[2 * i].shape[0]) * int(params[2 * i].shape[1])
                        for i in range(n_layers))
    transcendentals = B * sum(int(params[2 * i].shape[1])
                              for i, a in enumerate(acts)
                              if a in _TRANSCENDENTAL_ACTS)
    bytes_accessed = (int(x.size) * itemsize + param_bytes
                      + B * dout_pad * itemsize)
    cost = pl.CostEstimate(flops=flops, transcendentals=transcendentals,
                           bytes_accessed=bytes_accessed)

    # --- specs ----------------------------------------------------------------
    x_spec = pl.BlockSpec((tile_b, d_in), lambda i: (i, 0))
    param_specs = [pl.BlockSpec(p.shape, lambda i: (0, 0)) for p in params]
    out_spec = pl.BlockSpec((tile_b, dout_pad), lambda i: (i, 0))

    kernel = functools.partial(_mlp_fused_kernel, acts=acts,
                               valid_widths=valid_widths)

    y = pl.pallas_call(
        kernel,
        out_shape=jax.ShapeDtypeStruct((B, dout_pad), x.dtype),
        grid=grid,
        in_specs=[x_spec] + param_specs,
        out_specs=out_spec,
        compiler_params=pltpu.CompilerParams(
            dimension_semantics=("parallel",),
            vmem_limit_bytes=vmem_limit),
        cost_estimate=cost,
    )(x, *params)

    if dout_pad == out_dim:
        return y
    # Downstream consumers that tolerate lane padding could skip this slice.
    return y[:, :out_dim]


# ------------------------------ MLP wrapper ----------------------------------

class MLP:
    """Mirrors Network/MLP.py::MLP forward semantics with a fused Pallas kernel."""

    def __init__(self, model, activation, key):
        self.model = list(model)
        model_len = len(self.model)
        # Same activation-list expansion / validation logic as the PyTorch module.
        if len(activation) == 1:
            self.activation = [activation[0]] * (model_len - 1)
        elif model_len != len(activation) + 1:
            raise Exception(
                "Length of the model and the list of activation functions "
                "are not matched!")
        else:
            self.activation = list(activation)

        # Deterministic parameter init (PyTorch nn.Linear default:
        # U(-1/sqrt(fan_in), 1/sqrt(fan_in)) for both weight and bias).
        self.weights = []   # PyTorch layout: (out, in), f32 master copies
        self.biases = []    # (out,)
        flat_params = []    # kernel layout: bf16 (in_pad, out_pad) W, f32 (1, out_pad) b
        prev_pad = self.model[0]              # first layer in-axis matches raw x
        for i in range(model_len - 1):
            fan_in, fan_out = self.model[i], self.model[i + 1]
            key, kw, kb = jax.random.split(key, 3)
            bound = 1.0 / math.sqrt(fan_in)
            w = jax.random.uniform(kw, (fan_out, fan_in), jnp.float32,
                                   minval=-bound, maxval=bound)
            b = jax.random.uniform(kb, (fan_out,), jnp.float32,
                                   minval=-bound, maxval=bound)
            self.weights.append(w)
            self.biases.append(b)

            # Lane-pad EVERY layer to a multiple of 128 so all matmul outputs
            # and the final HBM store are lane-dense.  The zero rows appended
            # on this layer's in-axis (prev_pad > fan_in) kill whatever the
            # previous activation produced on its padded lanes (e.g.
            # sigmoid(0) = 0.5), keeping the math exact.
            out_pad = _round_up(fan_out, _LANE)
            w_k = jnp.zeros((prev_pad, out_pad), jnp.float32)
            w_k = w_k.at[:fan_in, :fan_out].set(w.T)
            b_k = jnp.zeros((1, out_pad), jnp.float32)
            b_k = b_k.at[0, :fan_out].set(b)
            flat_params.append(w_k.astype(jnp.bfloat16))  # MXU-native bf16
            flat_params.append(b_k)                       # tiny; kept f32
            prev_pad = out_pad

        self._params = tuple(jax.device_put(p) for p in flat_params)
        self._acts = tuple(None if a is None else str.lower(a)
                           for a in self.activation)
        self._valid_widths = tuple(self.model[1:])
        self._out_dim = self.model[-1]

    def forward(self, x):
        return _mlp_forward(x, self._params, self._acts, self._valid_widths,
                            self._out_dim)

    __call__ = forward


# --------------------------------- main ---------------------------------------

if __name__ == "__main__":
    key = jax.random.PRNGKey(0)
    key, kx, kp = jax.random.split(key, 3)

    # model = [in, hidden, hidden, out]; one activation per layer transition.
    model = [32, 64, 48, 16]
    activation = ["relu", "relu", "sigmoid"]

    batch = 8
    x = jax.random.normal(kx, (batch, model[0]), jnp.float32)

    mlp = MLP(model, activation, kp)
    y = mlp(x)
    jax.block_until_ready(y)

    # Pure-JAX reference of the same forward pass, using the same bf16
    # quantization of weights/activations the kernel feeds to the MXU.
    ref = x
    for w, b, a in zip(mlp.weights, mlp.biases, mlp.activation):
        w_q = w.astype(jnp.bfloat16).astype(jnp.float32)
        r_q = ref.astype(jnp.bfloat16).astype(jnp.float32)
        ref = r_q @ w_q.T + b
        act = None if a is None else str.lower(a)
        if act == "relu":
            ref = jnp.maximum(ref, 0.0)
        elif act == "sigmoid":
            ref = jax.nn.sigmoid(ref)
        elif act == "tanh":
            ref = jnp.tanh(ref)

    assert y.shape == (batch, model[-1])
    assert jnp.allclose(y, ref, atol=1e-3, rtol=1e-3), \
        float(jnp.max(jnp.abs(y - ref)))

    print("KERNEL_OK")
</pallas_src>

<mosaic_0001>
module attributes {stable_mosaic.version = 11 : i64} {
  func.func @_mlp_fused_kernel(%arg0: i32, %arg1: memref<8x32xf32, #tpu.memory_space<vmem>>, %arg2: memref<32x128xbf16, #tpu.memory_space<vmem>>, %arg3: memref<1x128xf32, #tpu.memory_space<vmem>>, %arg4: memref<128x128xbf16, #tpu.memory_space<vmem>>, %arg5: memref<1x128xf32, #tpu.memory_space<vmem>>, %arg6: memref<128x128xbf16, #tpu.memory_space<vmem>>, %arg7: memref<1x128xf32, #tpu.memory_space<vmem>>, %arg8: memref<8x128xf32, #tpu.memory_space<vmem>>) attributes {dimension_semantics = [#tpu.dimension_semantics<parallel>], iteration_bounds = array<i64: 1>, scalar_prefetch = 0 : i64, scratch_operands = 0 : i64, tpu.core_type = #tpu.core_type<tc>, window_params = [{transform_indices = @transform_0, window_bounds = array<i64: 8, 32>}, {pipeline_mode = #tpu.pipeline_mode<synchronous>, transform_indices = @transform_1, window_bounds = array<i64: 32, 128>}, {pipeline_mode = #tpu.pipeline_mode<synchronous>, transform_indices = @transform_2, window_bounds = array<i64: 1, 128>}, {pipeline_mode = #tpu.pipeline_mode<synchronous>, transform_indices = @transform_3, window_bounds = array<i64: 128, 128>}, {pipeline_mode = #tpu.pipeline_mode<synchronous>, transform_indices = @transform_4, window_bounds = array<i64: 1, 128>}, {pipeline_mode = #tpu.pipeline_mode<synchronous>, transform_indices = @transform_5, window_bounds = array<i64: 128, 128>}, {pipeline_mode = #tpu.pipeline_mode<synchronous>, transform_indices = @transform_6, window_bounds = array<i64: 1, 128>}, {transform_indices = @transform_7, window_bounds = array<i64: 8, 128>}]} {
    %c0 = arith.constant 0 : index
    %c0_0 = arith.constant 0 : index
    %0 = vector.load %arg1[%c0, %c0_0] : memref<8x32xf32, #tpu.memory_space<vmem>>, vector<8x32xf32>
    %1 = arith.truncf %0 : vector<8x32xf32> to vector<8x32xbf16>
    %c0_1 = arith.constant 0 : index
    %c0_2 = arith.constant 0 : index
    %2 = vector.load %arg2[%c0_1, %c0_2] : memref<32x128xbf16, #tpu.memory_space<vmem>>, vector<32x128xbf16>
    %cst = arith.constant dense<0.000000e+00> : vector<8x128xf32>
    %3 = tpu.matmul %1, %2, %cst {dimension_numbers = #tpu.dot_dimension_numbers<[1], [0], [0], [1], [0, 0, 1, 1], [], []>} : vector<8x32xbf16>, vector<32x128xbf16>, vector<8x128xf32> -> vector<8x128xf32>
    %c0_3 = arith.constant 0 : index
    %c0_4 = arith.constant 0 : index
    %4 = vector.load %arg3[%c0_3, %c0_4] : memref<1x128xf32, #tpu.memory_space<vmem>>, vector<1x128xf32>
    %5 = vector.broadcast %4 : vector<1x128xf32> to vector<8x128xf32>
    %6 = arith.addf %3, %5 : vector<8x128xf32>
    %cst_5 = arith.constant 0.000000e+00 : f32
    %7 = vector.broadcast %cst_5 : f32 to vector<8x128xf32>
    %8 = arith.maximumf %6, %7 : vector<8x128xf32>
    %9 = arith.truncf %8 : vector<8x128xf32> to vector<8x128xbf16>
    %c0_6 = arith.constant 0 : index
    %c0_7 = arith.constant 0 : index
    %10 = vector.load %arg4[%c0_6, %c0_7] : memref<128x128xbf16, #tpu.memory_space<vmem>>, vector<128x128xbf16>
    %cst_8 = arith.constant dense<0.000000e+00> : vector<8x128xf32>
    %11 = tpu.matmul %9, %10, %cst_8 {dimension_numbers = #tpu.dot_dimension_numbers<[1], [0], [0], [1], [0, 0, 1, 1], [], []>} : vector<8x128xbf16>, vector<128x128xbf16>, vector<8x128xf32> -> vector<8x128xf32>
    %c0_9 = arith.constant 0 : index
    %c0_10 = arith.constant 0 : index
    %12 = vector.load %arg5[%c0_9, %c0_10] : memref<1x128xf32, #tpu.memory_space<vmem>>, vector<1x128xf32>
    %13 = vector.broadcast %12 : vector<1x128xf32> to vector<8x128xf32>
    %14 = arith.addf %11, %13 : vector<8x128xf32>
    %cst_11 = arith.constant 0.000000e+00 : f32
    %15 = vector.broadcast %cst_11 : f32 to vector<8x128xf32>
    %16 = arith.maximumf %14, %15 : vector<8x128xf32>
    %17 = arith.truncf %16 : vector<8x128xf32> to vector<8x128xbf16>
    %c0_12 = arith.constant 0 : index
    %c0_13 = arith.constant 0 : index
    %18 = vector.load %arg6[%c0_12, %c0_13] : memref<128x128xbf16, #tpu.memory_space<vmem>>, vector<128x128xbf16>
    %cst_14 = arith.constant dense<0.000000e+00> : vector<8x128xf32>
    %19 = tpu.matmul %17, %18, %cst_14 {dimension_numbers = #tpu.dot_dimension_numbers<[1], [0], [0], [1], [0, 0, 1, 1], [], []>} : vector<8x128xbf16>, vector<128x128xbf16>, vector<8x128xf32> -> vector<8x128xf32>
    %c0_15 = arith.constant 0 : index
    %c0_16 = arith.constant 0 : index
    %20 = vector.load %arg7[%c0_15, %c0_16] : memref<1x128xf32, #tpu.memory_space<vmem>>, vector<1x128xf32>
    %21 = vector.broadcast %20 : vector<1x128xf32> to vector<8x128xf32>
    %22 = arith.addf %19, %21 : vector<8x128xf32>
    %23 = arith.negf %22 : vector<8x128xf32>
    %24 = math.exp %23 : vector<8x128xf32>
    %cst_17 = arith.constant 1.000000e+00 : f32
    %25 = vector.broadcast %cst_17 : f32 to vector<8x128xf32>
    %26 = arith.addf %25, %24 : vector<8x128xf32>
    %27 = arith.divf %25, %26 : vector<8x128xf32>
    %c0_18 = arith.constant 0 : index
    %c0_19 = arith.constant 0 : index
    %28 = vector.load %arg8[%c0_18, %c0_19] : memref<8x128xf32, #tpu.memory_space<vmem>>, vector<8x128xf32>
    tpu.vector_store %arg8[%c0_18, %c0_19], %27 {strides = array<i32>} : memref<8x128xf32, #tpu.memory_space<vmem>>, vector<8x128xf32>,
    return
  }
  func.func @transform_0(%arg0: i32) -> (i32, i32) {
    %c0_i32 = arith.constant 0 : i32
    %c0_i32_0 = arith.constant 0 : i32
    return %arg0, %c0_i32 : i32, i32
  }
  func.func @transform_1(%arg0: i32) -> (i32, i32) {
    %c0_i32 = arith.constant 0 : i32
    %c0_i32_0 = arith.constant 0 : i32
    %c0_i32_1 = arith.constant 0 : i32
    return %c0_i32, %c0_i32_0 : i32, i32
  }
  func.func @transform_2(%arg0: i32) -> (i32, i32) {
    %c0_i32 = arith.constant 0 : i32
    %c0_i32_0 = arith.constant 0 : i32
    %c0_i32_1 = arith.constant 0 : i32
    return %c0_i32, %c0_i32_0 : i32, i32
  }
  func.func @transform_3(%arg0: i32) -> (i32, i32) {
    %c0_i32 = arith.constant 0 : i32
    %c0_i32_0 = arith.constant 0 : i32
    %c0_i32_1 = arith.constant 0 : i32
    return %c0_i32, %c0_i32_0 : i32, i32
  }
  func.func @transform_4(%arg0: i32) -> (i32, i32) {
    %c0_i32 = arith.constant 0 : i32
    %c0_i32_0 = arith.constant 0 : i32
    %c0_i32_1 = arith.constant 0 : i32
    return %c0_i32, %c0_i32_0 : i32, i32
  }
  func.func @transform_5(%arg0: i32) -> (i32, i32) {
    %c0_i32 = arith.constant 0 : i32
    %c0_i32_0 = arith.constant 0 : i32
    %c0_i32_1 = arith.constant 0 : i32
    return %c0_i32, %c0_i32_0 : i32, i32
  }
  func.func @transform_6(%arg0: i32) -> (i32, i32) {
    %c0_i32 = arith.constant 0 : i32
    %c0_i32_0 = arith.constant 0 : i32
    %c0_i32_1 = arith.constant 0 : i32
    return %c0_i32, %c0_i32_0 : i32, i32
  }
  func.func @transform_7(%arg0: i32) -> (i32, i32) {
    %c0_i32 = arith.constant 0 : i32
    %c0_i32_0 = arith.constant 0 : i32
    return %arg0, %c0_i32 : i32, i32
  }
}

</mosaic_0001>

<bundles_post_ra>
// kernel: _mlp_forward.1
= control target key start
LH: loop header
LB: loop body
LE: loop exit
PB: predicated region body
PF: predicated region fallthrough
CT: control target
= control target key end

     0   :  { %12 = vsyncpa [#allocation3], 0  ;;  %s792_s0 = inlined_call_operand.hbm [shape: f32[8,32], index: 0, kind: input, shape index: {}]   ;;  %s793_s1 = inlined_call_operand.hbm [shape: bf16[32,128], index: 1, kind: input, shape index: {}]   ;;  %s794_s2 = inlined_call_operand.vmem [shape: f32[1,128], index: 2, kind: input, shape index: {}]   ;;  %s795_s3 = inlined_call_operand.hbm [shape: bf16[128,128], index: 3, kind: input, shape index: {}]   ;;  %s796_s4 = inlined_call_operand.vmem [shape: f32[1,128], index: 4, kind: input, shape index: {}]   ;;  %s797_s5 = inlined_call_operand.hbm [shape: bf16[128,128], index: 5, kind: input, shape index: {}]   ;;  %s798_s6 = inlined_call_operand.vmem [shape: f32[1,128], index: 6, kind: input, shape index: {}]   ;;  %s799_s7 = inlined_call_operand.hbm [shape: f32[8,128], index: 7, kind: output, shape index: {}]  }
   0x1   :  { %13 = vsyncpa [#allocation6], 0 }
   0x2   :  { %14 = vsyncpa [#allocation9], 0 }
   0x3   :  { %15 = vsyncpa [#allocation4], 0  ;;  %s641_s24 = smov [#allocation5]   ;;  %s523_s28 = scalar_lea.hbm %s793_s1, 256 }
   0x4   :  { %s31_s25 = sshll.u32 %s641_s24, 4  ;;  %p524_p0 = scmp.ne.s32.totalorder %s793_s1, %s523_s28  ;;  %s32_s25 = int_to_ptr.vmem [resolvable:$true] %s31_s25 }
   0x5   :  { %p527_p1 = scmp.lt.u32.totalorder %s523_s28, %s793_s1 }
   0x7   :  { %p529_p2 = pnand %p527_p1, %p524_p0 }
   0x9   :  { %532 = shalt.err (!%p529_p2)
}
   0xa   :  { %s533_s10 = scalar_lea.vmem %s32_s25, 256  ;;  %p538_p4 = scmp.lt.s32.totalorder %s32_s25, %s32_s25 }
   0xb   :  { %p534_p3 = scmp.ne.s32.totalorder %s32_s25, %s533_s10  ;;  %p539_p5 = scmp.lt.s32.totalorder %s533_s10, %s533_s10 }
   0xd   :  { %p540_p6 = por %p539_p5, %p538_p4 }
   0xf   :  { %p541_p7 = pnand %p540_p6, %p534_p3 }
  0x11   :  { %544 = shalt.err (!%p541_p7)
}
  0x12   :  { %s642_s11 = smov 64   ;;  %s643_s12 = smov 4  }
  0x13   :  { %37 = dma.hbm_to_vmem [thread:$0]  %s793_s1, 256, %s32_s25, [#allocation6], %s642_s11, %s642_s11, %s643_s12  }
  0x14   :  { %s644_s15 = smov [#allocation2]   ;;  %s645_s17 = smov [#allocation7]  }
  0x15   :  { %s22_s16 = sshll.u32 %s644_s15, 4  ;;  %s45_s18 = sshll.u32 %s645_s17, 4  ;;  %s23_s16 = int_to_ptr.vmem [resolvable:$true] %s22_s16  ;;  %s46_s18 = int_to_ptr.vmem [resolvable:$true] %s45_s18 }
  0x16   :  { %s545_s21 = scalar_lea.hbm %s792_s0, 128 }
  0x17   :  { %p546_p8 = scmp.ne.s32.totalorder %s792_s0, %s545_s21  ;;  %p549_p9 = scmp.lt.u32.totalorder %s545_s21, %s792_s0 }
  0x19   :  { %p551_p10 = pnand %p549_p9, %p546_p8 }
  0x1b   :  { %554 = shalt.err (!%p551_p10)
}
  0x1c   :  { %s555_s1 = scalar_lea.vmem %s23_s16, 128  ;;  %p560_p12 = scmp.lt.s32.totalorder %s23_s16, %s23_s16 }
  0x1d   :  { %p556_p11 = scmp.ne.s32.totalorder %s23_s16, %s555_s1  ;;  %p561_p13 = scmp.lt.s32.totalorder %s555_s1, %s555_s1 }
  0x1f   :  { %p562_p0 = por %p561_p13, %p560_p12 }
  0x21   :  { %p563_p1 = pnand %p562_p0, %p556_p11 }
  0x23   :  { %566 = shalt.err (!%p563_p1)
}
  0x24   :  { %25 = dma.hbm_to_vmem [thread:$0]  %s792_s0, 128, %s23_s16, [#allocation3]  }
  0x25   :  { %s567_s30 = scalar_lea.hbm %s795_s3, 1024 }
  0x26   :  { %p568_p2 = scmp.ne.s32.totalorder %s795_s3, %s567_s30  ;;  %p571_p3 = scmp.lt.u32.totalorder %s567_s30, %s795_s3 }
  0x28   :  { %p573_p4 = pnand %p571_p3, %p568_p2 }
  0x2a   :  { %576 = shalt.err (!%p573_p4)
}
  0x2b   :  { %s577_s14 = scalar_lea.vmem %s46_s18, 1024  ;;  %p582_p6 = scmp.lt.s32.totalorder %s46_s18, %s46_s18 }
  0x2c   :  { %p578_p5 = scmp.ne.s32.totalorder %s46_s18, %s577_s14  ;;  %p583_p7 = scmp.lt.s32.totalorder %s577_s14, %s577_s14 }
  0x2e   :  { %p584_p8 = por %p583_p7, %p582_p6 }
  0x30   :  { %p585_p9 = pnand %p584_p8, %p578_p5 }
  0x32   :  { %588 = shalt.err (!%p585_p9)
}
  0x33   :  { %51 = dma.hbm_to_vmem [thread:$0]  %s795_s3, 1024, %s46_s18, [#allocation6], %s642_s11, %s642_s11, %s643_s12  }
  0x34   :  { %s646_s16 = smov [#allocation8]   ;;  %s589_s21 = scalar_lea.hbm %s797_s5, 1024 }
  0x35   :  { %s59_s17 = sshll.u32 %s646_s16, 4  ;;  %p590_p10 = scmp.ne.s32.totalorder %s797_s5, %s589_s21  ;;  %s60_s17 = int_to_ptr.vmem [resolvable:$true] %s59_s17 }
  0x36   :  { %p593_p11 = scmp.lt.u32.totalorder %s589_s21, %s797_s5 }
  0x38   :  { %p595_p12 = pnand %p593_p11, %p590_p10 }
  0x3a   :  { %598 = shalt.err (!%p595_p12)
}
  0x3b   :  { %s599_s1 = scalar_lea.vmem %s60_s17, 1024  ;;  %p604_p0 = scmp.lt.s32.totalorder %s60_s17, %s60_s17 }
  0x3c   :  { %p600_p13 = scmp.ne.s32.totalorder %s60_s17, %s599_s1  ;;  %p605_p1 = scmp.lt.s32.totalorder %s599_s1, %s599_s1 }
  0x3e   :  { %p606_p2 = por %p605_p1, %p604_p0 }
  0x40   :  { %p607_p3 = pnand %p606_p2, %p600_p13 }
  0x42   :  { %610 = shalt.err (!%p607_p3)
}
  0x43   :  { %65 = dma.hbm_to_vmem [thread:$0]  %s797_s5, 1024, %s60_s17, [#allocation9], %s642_s11, %s642_s11, %s643_s12  }
  0x44   :  { %633 = dma.done.wait [#allocation3], 128  }
  0x45   :  { %634 = vsyncadd [#allocation3], 4294967168 }
  0x46   :  { %635 = dma.done.wait [#allocation6], 1280  }
  0x47   :  { %636 = vsyncadd [#allocation6], 4294966016 }
  0x48   :  { %637 = dma.done.wait [#allocation9], 1024  }
  0x49   :  { %638 = vsyncadd [#allocation9], 4294966272  ;;  %v647_v0 = vmov 0.0   ;;  %vm648_vm0 = vmmov 0   ;;  %v501_v1 = vld [vmem:[#allocation5] sm:$0xff]   ;;  %v502_v2 = vld [vmem:[#allocation5 + $0x8] sm:$0xff]  }
  0x4a   :  { %444 = vmatprep.subr.bf16.mxu0 %v647_v0  ;;  %448 = vmatprep.mubr.msk.bf16.mxu0 %vm648_vm0, %v647_v0  ;;  %v81_v3 = vld [vmem:[#allocation2] sm:$0xff]  ;;  %v503_v4 = vld [vmem:[#allocation7] sm:$0xff]   ;;  %vm106_vm1 = vcmask 261120   ;;  %v505_v7 = vld [vmem:[#allocation7 + $0x10] sm:$0xff]  }
  0x4b   :  { %452 = vmatprep.subr.bf16.mxu1 %v647_v0  ;;  %468 = vmatprep.mubr.msk.bf16.mxu1 %vm648_vm0, %v647_v0  ;;  %v82_v5 = vpack.c.bf16 %v81_v3, %v81_v3  ;;  %v504_v6 = vld [vmem:[#allocation7 + $0x8] sm:$0xff]   ;;  %v506_v8 = vld [vmem:[#allocation7 + $0x18] sm:$0xff]   ;;  %v507_v9 = vld [vmem:[#allocation7 + $0x20] sm:$0xff]  }
  0x4c   :  { %445 = vmatpush3.bf16.msra.mxu0 %v501_v1  ;;  %453 = vmatpush3.bf16.msra.mxu1 %v503_v4  ;;  %v508_v10 = vld [vmem:[#allocation7 + $0x28] sm:$0xff]   ;;  %v509_v11 = vld [vmem:[#allocation7 + $0x30] sm:$0xff]   ;;  %v510_v12 = vld [vmem:[#allocation7 + $0x38] sm:$0xff]  }
  0x4d   :  { %446 = vmatprep.subr.bf16.mxu0 %v647_v0  ;;  %454 = vmatprep.subr.bf16.mxu1 %v647_v0  ;;  %v511_v13 = vld [vmem:[#allocation8] sm:$0xff]   ;;  %v512_v14 = vld [vmem:[#allocation8 + $0x8] sm:$0xff]   ;;  %v513_v15 = vld [vmem:[#allocation8 + $0x10] sm:$0xff]  }
  0x4e   :  { %v514_v16 = vld [vmem:[#allocation8 + $0x18] sm:$0xff]   ;;  %v515_v17 = vld [vmem:[#allocation8 + $0x20] sm:$0xff]   ;;  %v516_v18 = vld [vmem:[#allocation8 + $0x28] sm:$0xff]  }
  0x4f   :  { %v400_v19 = vld [vmem:[%s794_s2] ss:$0 sm:$0xff]  ;;  %v517_v27 = vld [vmem:[#allocation8 + $0x30] sm:$0xff]   ;;  %v518_v28 = vld [vmem:[#allocation8 + $0x38] sm:$0xff]  }
  0x50   :  { %447 = vmatpush3.bf16.msra.mxu0 %v502_v2  ;;  %455 = vmatpush3.bf16.msra.mxu1 %v504_v6  ;;  %v404_v29 = vld [vmem:[%s796_s4] ss:$0 sm:$0xff]  ;;  %s649_s4 = smov [#allocation10]  }
  0x51   :  { %472 = vmatprep.subr.bf16.mxu0 %v647_v0  ;;  %456 = vmatprep.subr.bf16.mxu1 %v647_v0  ;;  %v413_v37 = vld [vmem:[%s798_s6] ss:$0 sm:$0xff]  ;;  %s389_s28 = sshll.u32 %s649_s4, 4  ;;  %s390_s28 = int_to_ptr.vmem [resolvable:$true] %s389_s28 }
  0x52   :  { %s611_s29 = scalar_lea.vmem %s390_s28, 128  ;;  %p616_p5 = scmp.lt.s32.totalorder %s390_s28, %s390_s28 }
  0x53   :  { %449 = vmatmul.mubr.msk.bf16.vlgmr.msra.gmra.mrb[0].mxu0 %vm106_vm1, %v82_v5  ;;  %p612_p4 = scmp.ne.s32.totalorder %s390_s28, %s611_s29  ;;  %p617_p6 = scmp.lt.s32.totalorder %s611_s29, %s611_s29 }
  0x54   :  { %488 = vmatprep.mubr.msk.bf16.mxu0 %vm648_vm0, %v647_v0  ;;  %457 = vmatpush3.bf16.msra.mxu1 %v505_v7 }
  0x55   :  { %458 = vmatprep.subr.bf16.mxu1 %v647_v0  ;;  %473 = vmatpush3.bf16.msra.mxu0 %v511_v13  ;;  %p618_p7 = por %p617_p6, %p616_p5 }
  0x56   :  { %474 = vmatprep.subr.bf16.mxu0 %v647_v0 }
  0x57   :  { %p619_p8 = pnand %p618_p7, %p612_p4 }
  0x58   :  { %459 = vmatpush3.bf16.msra.mxu1 %v506_v8 }
  0x59   :  { %460 = vmatprep.subr.bf16.mxu1 %v647_v0  ;;  %475 = vmatpush3.bf16.msra.mxu0 %v512_v14 }
  0x5a   :  { %476 = vmatprep.subr.bf16.mxu0 %v647_v0 }
  0x5c   :  { %461 = vmatpush3.bf16.msra.mxu1 %v507_v9 }
  0x5d   :  { %462 = vmatprep.subr.bf16.mxu1 %v647_v0  ;;  %477 = vmatpush3.bf16.msra.mxu0 %v513_v15 }
  0x5e   :  { %478 = vmatprep.subr.bf16.mxu0 %v647_v0 }
  0x60   :  { %463 = vmatpush3.bf16.msra.mxu1 %v508_v10 }
  0x61   :  { %464 = vmatprep.subr.bf16.mxu1 %v647_v0  ;;  %479 = vmatpush3.bf16.msra.mxu0 %v514_v16 }
  0x62   :  { %480 = vmatprep.subr.bf16.mxu0 %v647_v0 }
  0x64   :  { %465 = vmatpush3.bf16.msra.mxu1 %v509_v11 }
  0x65   :  { %466 = vmatprep.subr.bf16.mxu1 %v647_v0  ;;  %481 = vmatpush3.bf16.msra.mxu0 %v515_v17 }
  0x66   :  { %482 = vmatprep.subr.bf16.mxu0 %v647_v0 }
  0x68   :  { %467 = vmatpush3.bf16.msra.mxu1 %v510_v12 }
  0x69   :  { %483 = vmatpush3.bf16.msra.mxu0 %v516_v18 }
  0x6a   :  { %484 = vmatprep.subr.bf16.mxu0 %v647_v0 }
  0x6d   :  { %485 = vmatpush3.bf16.msra.mxu0 %v517_v27 }
  0x6e   :  { %486 = vmatprep.subr.bf16.mxu0 %v647_v0 }
  0x71   :  { %487 = vmatpush3.bf16.msra.mxu0 %v518_v28 }
 0x126   :  { %v144_v20 = vpop.f32.mrb[0].mxu0 }
 0x127   :  { %v145_v21 = vadd.f32 %v400_v19, %v144_v20  ;;  %v450_v22 = vpop.f32.mrb[1].mxu0 }
 0x128   :  { %v147_v23 = vpop.f32.mrb[2].mxu0 }
 0x129   :  { %v150_v24 = vmax.f32 %v145_v21, 0.0  ;;  %v451_v25 = vpop.f32.mrb[3].mxu0 }
 0x12b   :  { %v151_v26 = vpack.c.bf16 %v150_v24, %v150_v24 }
 0x12d   :  { %469 = vmatmul.mubr.bf16.vlgmr.msra.gmra.mrb[0].mxu1 %v151_v26 }
 0x200   :  { %v257_v30 = vpop.f32.mrb[0].mxu1 }
 0x201   :  { %v258_v31 = vadd.f32 %v404_v29, %v257_v30  ;;  %v470_v32 = vpop.f32.mrb[1].mxu1 }
 0x202   :  { %v260_v33 = vpop.f32.mrb[2].mxu1 }
 0x203   :  { %v263_v34 = vmax.f32 %v258_v31, 0.0  ;;  %v471_v35 = vpop.f32.mrb[3].mxu1 }
 0x205   :  { %v264_v36 = vpack.c.bf16 %v263_v34, %v263_v34 }
 0x207   :  { %489 = vmatmul.mubr.bf16.vlgmr.msra.gmra.mrb[4].mxu0 %v264_v36 }
 0x2da   :  { %v370_v38 = vpop.f32.mrb[4].mxu0 }
 0x2db   :  { %v371_v39 = vadd.f32 %v413_v37, %v370_v38  ;;  %v490_v40 = vpop.f32.mrb[5].mxu0 }
 0x2dc   :  { %v373_v41 = vpop.f32.mrb[6].mxu0 }
 0x2dd   :  { %v422_v42 = vmul.f32 -1.442695, %v371_v39  ;;  %v491_v43 = vpop.f32.mrb[7].mxu0 }
 0x2df   :  { %519 = vpow2.f32 %v422_v42 }
 0x2e9   :  { %v520_v44 = vpop.eup %519 }
 0x2ea   :  { %v379_v45 = vadd.f32 1.0, %v520_v44 }
 0x2ec   :  { %521 = vrcp.f32 %v379_v45 }
 0x2f6   :  { %v522_v46 = vpop.eup %521 }
 0x2f7   :  { %382 = vst [vmem:[#allocation10] sm:$0xff] %v522_v46 }
 0x2f8   :  { %622 = shalt.err (!%p619_p8)
}
 0x2f9   :  { %s623_s8 = scalar_lea.hbm %s799_s7, 128 }
 0x2fa   :  { %p624_p9 = scmp.ne.s32.totalorder %s799_s7, %s623_s8  ;;  %p627_p10 = scmp.lt.u32.totalorder %s623_s8, %s799_s7 }
 0x2fc   :  { %p629_p11 = pnand %p627_p10, %p624_p9 }
 0x2fe   :  { %632 = shalt.err (!%p629_p11)
}
 0x2ff   :  { %392 = dma.vmem_to_hbm [thread:$0]  %s390_s28, 128, %s799_s7, [#allocation4]  }
 0x300   :  { %639 = dma.done.wait [#allocation4], 128  }
 0x301   :  { %640 = vsyncadd [#allocation4], 4294967168 }
 0x302   :  { %396 = vsyncpa [#allocation3], 1 }
 0x303   :  { %397 = vsyncpa [#allocation6], 1 }
 0x304   :  { %398 = vsyncpa [#allocation9], 1 }
 0x305   :  { %399 = vsyncpa [#allocation4], 1 }

</bundles_post_ra>
